<compile_context>
chip_gen: v6e
topology: v6e:2x2x1
jax: 0.10.0
libtpu: 0.0.40
codegen_flags: <defaults>
</compile_context>

<pallas_src>
import functools

import jax
import jax.numpy as jnp
import numpy as np
from jax.experimental import pallas as pl
from jax.experimental.pallas import tpu as pltpu


# ------------------------------- kernel ------------------------------------


def attention_kernel(pq_ref, pm_ref, patch_ref, mask_ref, mem_ref,
                     wloc_ref, v_ref, ctx_ref, w_ref):
    """One batch block per grid step.

    pq_ref   : (Bb, attn, 1)   processed query (query_layer output), sublane=attn
    pm_ref   : (Bb, attn, T)   processed_memory, transposed so T is on lanes
    patch_ref: (Bb, 2K, T)     zero-padded location taps (patch matrix)
    mask_ref : (Bb, 1, T)      float mask (1.0 -> padded position)
    mem_ref  : (Bb, T, emb)    encoder outputs (memory)
    wloc_ref : (attn, 2K)      fused location_conv + location_dense weight
    v_ref    : (1, attn)       v weight
    ctx_ref  : (Bb, 1, emb)    attention_context out
    w_ref    : (Bb, 1, T)      attention_weights out (lane-dense in T)
    """
    Bb = pm_ref.shape[0]
    attn = wloc_ref.shape[0]
    k2 = wloc_ref.shape[1]

    # (b, m, k) x (b, k, n) -> (b, m, n)
    dn = (((2,), (1,)), ((0,), (0,)))

    # Location term: a single batched MXU contraction over the 2K conv taps.
    wloc_b = jnp.broadcast_to(wloc_ref[...][None, :, :], (Bb, attn, k2))
    loc = jax.lax.dot_general(wloc_b, patch_ref[...], dn,
                              preferred_element_type=jnp.float32)   # (Bb, attn, T)

    # processed_query (broadcast over T on lanes) + location + processed_memory.
    acc = loc + pm_ref[...] + pq_ref[...]
    e = jnp.tanh(acc)                                               # (Bb, attn, T)

    # energies = v . tanh(...): (Bb,1,attn) x (Bb,attn,T) -> (Bb,1,T).
    v_b = jnp.broadcast_to(v_ref[...][None, :, :], (Bb, 1, attn))
    energies = jax.lax.dot_general(v_b, e, dn,
                                   preferred_element_type=jnp.float32)

    # masked_fill_(mask, -inf): large finite value -> identical softmax for any
    # row with >=1 valid frame, avoids NaN on fully-masked rows.
    energies = jnp.where(mask_ref[...] != 0, jnp.float32(-1e30), energies)

    # Softmax over T (lane reductions); EUP approx reciprocal for the denominator.
    m = jnp.max(energies, axis=-1, keepdims=True)                   # (Bb,1,1)
    ex = jnp.exp(energies - m)
    s = jnp.sum(ex, axis=-1, keepdims=True)
    w = ex * pl.reciprocal(s, approx=True)                          # (Bb,1,T)
    w_ref[...] = w

    # attention_context = bmm(w, memory): (Bb,1,T) x (Bb,T,emb) -> (Bb,1,emb).
    ctx_ref[...] = jax.lax.dot_general(w, mem_ref[...], dn,
                                       preferred_element_type=jnp.float32)


# ------------------------------ wrapper ------------------------------------


def _ceil_to(x, m):
    return (x + m - 1) // m * m


def _tile_bytes(shape, itemsize=4):
    """Per-batch-element VMEM bytes of a block slice with (8,128) tile padding."""
    r = shape[-2] if len(shape) >= 2 else 1
    c = shape[-1]
    lead = 1
    for d in shape[:-2]:
        lead *= d
    return lead * _ceil_to(r, 8) * _ceil_to(c, 128) * itemsize


def _pick_batch_block(B, per_elem_bytes, step_budget_bytes):
    """Largest divisor of B whose per-step footprint fits the budget; prefer
    >=2 grid steps so a 2-TensorCore chip (v7x) is not half idle."""
    divisors = [d for d in range(1, B + 1) if B % d == 0]
    fitting = [d for d in divisors if d * per_elem_bytes <= step_budget_bytes] or [1]
    bb = max(fitting)
    if bb == B and B > 1:
        smaller = [d for d in fitting if d < B]
        if smaller:
            bb = max(smaller)
    return bb


@functools.partial(jax.jit, static_argnames=("kernel_size",))
def attention_forward(attention_hidden_state, memory, processed_memory,
                      attention_weights_cat, mask, params, *, kernel_size):
    """Pallas-backed Attention.forward.

    attention_hidden_state: (B, rnn_dim) f32
    memory:                 (B, T, emb_dim) f32
    processed_memory:       (B, T, attn_dim) f32
    attention_weights_cat:  (B, 2, T) f32
    mask:                   (B, T) bool (True == padded position)
    returns (attention_context (B, emb_dim), attention_weights (B, T))
    """
    B, T, emb_dim = memory.shape
    attn_dim = processed_memory.shape[2]
    K = kernel_size
    P = (K - 1) // 2
    K2 = 2 * K

    w_query, w_conv, w_dense, w_v = (params["w_query"], params["w_conv"],
                                     params["w_dense"], params["w_v"])

    # ---- XLA-side prep (tiny GEMM / layout-only reshapes) -------------------
    # query_layer: (B, rnn) @ (rnn, attn); passed as (B, attn, 1) so the kernel
    # adds it with a cheap lane broadcast over T.
    pq = (attention_hidden_state @ w_query.T)[:, :, None]            # (B, attn, 1)

    # Fuse Conv1d(2->nf, K, bias=False) + Linear(nf->attn, bias=False) into one
    # (attn, 2K) tap matrix, flattened in (k, c) order.
    wloc = jnp.einsum("af,fck->akc", w_dense, w_conv).reshape(attn_dim, K2)

    # Zero-padded tap/patch matrix (B, 2K, T), T on the lane axis, (k, c) order.
    padded = jnp.pad(attention_weights_cat, ((0, 0), (0, 0), (P, P)))
    patches = jnp.stack([padded[:, :, k:k + T] for k in range(K)],
                        axis=1).reshape(B, K2, T)
    # TODO(synk): for very large K, build the patch matrix in-kernel from
    # (B, 2, T+2P) with pltpu.roll lane shifts instead of K-fold HBM inflation.

    pm_t = jnp.transpose(processed_memory, (0, 2, 1))                 # (B, attn, T)
    mask_f = mask.astype(jnp.float32).reshape(B, 1, T)                # (B, 1, T)
    v_row = w_v.reshape(1, attn_dim)                                  # (1, attn)

    # ---- batch-block sizing against a double-buffered VMEM budget -----------
    per_elem = (_tile_bytes((attn_dim, 1)) + _tile_bytes((attn_dim, T)) +
                _tile_bytes((K2, T)) + _tile_bytes((1, T)) +
                _tile_bytes((T, emb_dim)) + _tile_bytes((1, emb_dim)) +
                _tile_bytes((1, T)))
    # 16 MiB per step -> <= 32 MiB double-buffered; safe on v7x's 64 MiB VMEM.
    Bb = _pick_batch_block(B, per_elem, step_budget_bytes=16 * 1024 * 1024)
    grid = (B // Bb,)
    # NOTE: for very long encoder lengths, add a trailing 'arbitrary' grid axis
    # over T with an online-softmax accumulator instead of holding (Bb, T, emb)
    # resident; unnecessary at these shapes.

    blk3 = lambda i: (i, 0, 0)
    cst2 = lambda i: (0, 0)

    ctx3, w3 = pl.pallas_call(
        attention_kernel,
        out_shape=(
            jax.ShapeDtypeStruct((B, 1, emb_dim), jnp.float32),
            jax.ShapeDtypeStruct((B, 1, T), jnp.float32),
        ),
        grid_spec=pltpu.PrefetchScalarGridSpec(
            num_scalar_prefetch=0,
            grid=grid,
            in_specs=[
                pl.BlockSpec((Bb, attn_dim, 1), blk3),      # pq
                pl.BlockSpec((Bb, attn_dim, T), blk3),      # processed_memory^T
                pl.BlockSpec((Bb, K2, T), blk3),            # location patches
                pl.BlockSpec((Bb, 1, T), blk3),             # mask
                pl.BlockSpec((Bb, T, emb_dim), blk3),       # memory
                pl.BlockSpec((attn_dim, K2), cst2),         # fused location weight
                pl.BlockSpec((1, attn_dim), cst2),          # v
            ],
            out_specs=[
                pl.BlockSpec((Bb, 1, emb_dim), blk3),
                pl.BlockSpec((Bb, 1, T), blk3),
            ],
        ),
        compiler_params=pltpu.CompilerParams(
            dimension_semantics=("parallel",),
            vmem_limit_bytes=48 * 1024 * 1024),
    )(pq, pm_t, patches, mask_f, memory, wloc, v_row)

    return ctx3[:, 0, :], w3[:, 0, :]


# ---------------- pure-JAX reference (mirrors the PyTorch module) -----------


def unfold_attention_weights(aw_cat, kernel_size):
    """(B, 2, T) -> (B, T, 2*K) patch matrix matching Conv1d(padding=(K-1)//2)."""
    B, C, T = aw_cat.shape
    P = (kernel_size - 1) // 2
    padded = jnp.pad(aw_cat, ((0, 0), (0, 0), (P, P)))
    idx = jnp.arange(T)[:, None] + jnp.arange(kernel_size)[None, :]   # (T, K)
    patches = padded[:, :, idx]                                       # (B, 2, T, K)
    return jnp.transpose(patches, (0, 2, 1, 3)).reshape(B, T, C * kernel_size)


def reference_forward(attention_hidden_state, memory, processed_memory,
                      attention_weights_cat, mask, params, kernel_size):
    w_query, w_conv, w_dense, w_v = (params["w_query"], params["w_conv"],
                                     params["w_dense"], params["w_v"])
    pq = attention_hidden_state[:, None, :] @ w_query.T       # (B, 1, attn)
    u = unfold_attention_weights(attention_weights_cat, kernel_size)
    wc = jnp.transpose(w_conv, (1, 2, 0)).reshape(2 * kernel_size, -1)
    loc = u @ wc                                               # (B, T, nf)
    pa = loc @ w_dense.T                                       # (B, T, attn)
    energies = jnp.tanh(pq + pa + processed_memory) @ w_v.T    # (B, T, 1)
    energies = energies[..., 0]
    energies = jnp.where(mask, -jnp.inf, energies)
    weights = jax.nn.softmax(energies, axis=1)
    ctx = jnp.einsum("bt,bte->be", weights, memory)
    return ctx, weights


if __name__ == "__main__":
    B = 16
    attention_rnn_dim = 32
    embedding_dim = 32
    attention_dim = 16
    attention_location_n_filters = 8
    attention_location_kernel_size = 5
    T = 16

    key = jax.random.PRNGKey(0)
    ks = jax.random.split(key, 8)

    def xavier(k, shape, gain=1.0):
        fan_out, fan_in = shape[0], int(np.prod(shape[1:]))
        bound = gain * np.sqrt(6.0 / (fan_in + fan_out))
        return jax.random.uniform(k, shape, jnp.float32, -bound, bound)

    tanh_gain = 5.0 / 3.0
    params = {
        "w_query": xavier(ks[0], (attention_dim, attention_rnn_dim), tanh_gain),
        "w_conv": xavier(ks[1], (attention_location_n_filters, 2,
                                 attention_location_kernel_size), 1.0),
        "w_dense": xavier(ks[2], (attention_dim,
                                  attention_location_n_filters), tanh_gain),
        "w_v": xavier(ks[3], (1, attention_dim), 1.0),
    }

    attention_hidden_state = jax.random.normal(
        ks[4], (B, attention_rnn_dim), jnp.float32)
    memory = jax.random.normal(ks[5], (B, T, embedding_dim), jnp.float32)
    processed_memory = jax.random.normal(
        ks[6], (B, T, attention_dim), jnp.float32)
    aw = jax.nn.softmax(
        jax.random.normal(ks[7], (B, 2, T), jnp.float32), axis=-1)

    # mask: True for padded positions; every sequence keeps >= 1 valid frame.
    lengths = jnp.maximum(T - (jnp.arange(B, dtype=jnp.int32) % 7), 1)
    mask = jnp.arange(T)[None, :] >= lengths[:, None]          # (B, T) bool

    ctx, weights = attention_forward(
        attention_hidden_state, memory, processed_memory, aw, mask, params,
        kernel_size=attention_location_kernel_size)
    ctx, weights = jax.block_until_ready((ctx, weights))

    ctx_ref, w_ref_ = reference_forward(
        attention_hidden_state, memory, processed_memory, aw, mask, params,
        attention_location_kernel_size)

    # Tolerances loosened slightly for the EUP approx reciprocal in the softmax.
    np.testing.assert_allclose(np.asarray(weights), np.asarray(w_ref_),
                               rtol=5e-3, atol=1e-5)
    np.testing.assert_allclose(np.asarray(ctx), np.asarray(ctx_ref),
                               rtol=5e-3, atol=5e-4)
    assert ctx.shape == (B, embedding_dim) and weights.shape == (B, T)

    print("KERNEL_OK")
</pallas_src>

<mosaic_0001>
module attributes {stable_mosaic.version = 11 : i64} {
  func.func @attention_kernel(%arg0: i32, %arg1: memref<8x16x1xf32, #tpu.memory_space<vmem>>, %arg2: memref<8x16x16xf32, #tpu.memory_space<vmem>>, %arg3: memref<8x10x16xf32, #tpu.memory_space<vmem>>, %arg4: memref<8x1x16xf32, #tpu.memory_space<vmem>>, %arg5: memref<8x16x32xf32, #tpu.memory_space<vmem>>, %arg6: memref<16x10xf32, #tpu.memory_space<vmem>>, %arg7: memref<1x16xf32, #tpu.memory_space<vmem>>, %arg8: memref<8x1x32xf32, #tpu.memory_space<vmem>>, %arg9: memref<8x1x16xf32, #tpu.memory_space<vmem>>) attributes {dimension_semantics = [#tpu.dimension_semantics<parallel>], iteration_bounds = array<i64: 2>, scalar_prefetch = 0 : i64, scratch_operands = 0 : i64, tpu.core_type = #tpu.core_type<tc>, window_params = [{transform_indices = @transform_0, window_bounds = array<i64: 8, 16, 1>}, {transform_indices = @transform_1, window_bounds = array<i64: 8, 16, 16>}, {transform_indices = @transform_2, window_bounds = array<i64: 8, 10, 16>}, {transform_indices = @transform_3, window_bounds = array<i64: 8, 1, 16>}, {transform_indices = @transform_4, window_bounds = array<i64: 8, 16, 32>}, {pipeline_mode = #tpu.pipeline_mode<synchronous>, transform_indices = @transform_5, window_bounds = array<i64: 16, 10>}, {pipeline_mode = #tpu.pipeline_mode<synchronous>, transform_indices = @transform_6, window_bounds = array<i64: 1, 16>}, {transform_indices = @transform_7, window_bounds = array<i64: 8, 1, 32>}, {transform_indices = @transform_8, window_bounds = array<i64: 8, 1, 16>}]} {
    %c0 = arith.constant 0 : index
    %c0_0 = arith.constant 0 : index
    %0 = vector.load %arg6[%c0, %c0_0] : memref<16x10xf32, #tpu.memory_space<vmem>>, vector<16x10xf32>
    %1 = vector.shape_cast %0 : vector<16x10xf32> to vector<1x16x10xf32>
    %2 = vector.shape_cast %1 : vector<1x16x10xf32> to vector<1x16x10xf32>
    %3 = vector.broadcast %2 : vector<1x16x10xf32> to vector<8x16x10xf32>
    %c0_1 = arith.constant 0 : index
    %c0_2 = arith.constant 0 : index
    %c0_3 = arith.constant 0 : index
    %4 = vector.load %arg3[%c0_1, %c0_2, %c0_3] : memref<8x10x16xf32, #tpu.memory_space<vmem>>, vector<8x10x16xf32>
    %cst = arith.constant dense<0.000000e+00> : vector<8x16x16xf32>
    %5 = tpu.matmul %3, %4, %cst {dimension_numbers = #tpu.dot_dimension_numbers<[2], [1], [1], [2], [0, 0, 0, 1, 1, 2], [0], [0]>} : vector<8x16x10xf32>, vector<8x10x16xf32>, vector<8x16x16xf32> -> vector<8x16x16xf32>
    %c0_4 = arith.constant 0 : index
    %c0_5 = arith.constant 0 : index
    %c0_6 = arith.constant 0 : index
    %6 = vector.load %arg2[%c0_4, %c0_5, %c0_6] : memref<8x16x16xf32, #tpu.memory_space<vmem>>, vector<8x16x16xf32>
    %7 = arith.addf %5, %6 : vector<8x16x16xf32>
    %c0_7 = arith.constant 0 : index
    %c0_8 = arith.constant 0 : index
    %c0_9 = arith.constant 0 : index
    %8 = vector.load %arg1[%c0_7, %c0_8, %c0_9] : memref<8x16x1xf32, #tpu.memory_space<vmem>>, vector<8x16x1xf32>
    %9 = vector.broadcast %8 : vector<8x16x1xf32> to vector<8x16x16xf32>
    %10 = arith.addf %7, %9 : vector<8x16x16xf32>
    %11 = math.tanh %10 : vector<8x16x16xf32>
    %c0_10 = arith.constant 0 : index
    %c0_11 = arith.constant 0 : index
    %12 = vector.load %arg7[%c0_10, %c0_11] : memref<1x16xf32, #tpu.memory_space<vmem>>, vector<1x16xf32>
    %13 = vector.shape_cast %12 : vector<1x16xf32> to vector<1x1x16xf32>
    %14 = vector.shape_cast %13 : vector<1x1x16xf32> to vector<1x1x16xf32>
    %15 = vector.broadcast %14 : vector<1x1x16xf32> to vector<8x1x16xf32>
    %cst_12 = arith.constant dense<0.000000e+00> : vector<8x1x16xf32>
    %16 = tpu.matmul %15, %11, %cst_12 {dimension_numbers = #tpu.dot_dimension_numbers<[2], [1], [1], [2], [0, 0, 0, 1, 1, 2], [0], [0]>} : vector<8x1x16xf32>, vector<8x16x16xf32>, vector<8x1x16xf32> -> vector<8x1x16xf32>
    %c0_13 = arith.constant 0 : index
    %c0_14 = arith.constant 0 : index
    %c0_15 = arith.constant 0 : index
    %17 = vector.load %arg4[%c0_13, %c0_14, %c0_15] : memref<8x1x16xf32, #tpu.memory_space<vmem>>, vector<8x1x16xf32>
    %cst_16 = arith.constant 0.000000e+00 : f32
    %18 = vector.broadcast %cst_16 : f32 to vector<8x1x16xf32>
    %19 = arith.cmpf one, %17, %18 : vector<8x1x16xf32>
    %cst_17 = arith.constant -1.000000e+30 : f32
    %20 = vector.broadcast %cst_17 : f32 to vector<8x1x16xf32>
    %21 = arith.select %19, %20, %16 : vector<8x1x16xi1>, vector<8x1x16xf32>
    %cst_18 = arith.constant dense<0xFF800000> : vector<8x1xf32>
    %22 = vector.multi_reduction <maximumf>, %21, %cst_18 [2] : vector<8x1x16xf32> to vector<8x1xf32>
    %23 = vector.shape_cast %22 : vector<8x1xf32> to vector<8x1x1xf32>
    %24 = vector.broadcast %23 : vector<8x1x1xf32> to vector<8x1x16xf32>
    %25 = arith.subf %21, %24 : vector<8x1x16xf32>
    %26 = math.exp %25 : vector<8x1x16xf32>
    %cst_19 = arith.constant dense<0.000000e+00> : vector<8x1xf32>
    %27 = vector.multi_reduction <add>, %26, %cst_19 [2] : vector<8x1x16xf32> to vector<8x1xf32>
    %28 = vector.shape_cast %27 : vector<8x1xf32> to vector<8x1x1xf32>
    %29 = tpu.reciprocal %28 {approx = true} : vector<8x1x1xf32> -> vector<8x1x1xf32>
    %30 = vector.broadcast %29 : vector<8x1x1xf32> to vector<8x1x16xf32>
    %31 = arith.mulf %26, %30 : vector<8x1x16xf32>
    %c0_20 = arith.constant 0 : index
    %c0_21 = arith.constant 0 : index
    %c0_22 = arith.constant 0 : index
    %32 = vector.load %arg9[%c0_20, %c0_21, %c0_22] : memref<8x1x16xf32, #tpu.memory_space<vmem>>, vector<8x1x16xf32>
    tpu.vector_store %arg9[%c0_20, %c0_21, %c0_22], %31 {strides = array<i32>} : memref<8x1x16xf32, #tpu.memory_space<vmem>>, vector<8x1x16xf32>,
    %c0_23 = arith.constant 0 : index
    %c0_24 = arith.constant 0 : index
    %c0_25 = arith.constant 0 : index
    %33 = vector.load %arg5[%c0_23, %c0_24, %c0_25] : memref<8x16x32xf32, #tpu.memory_space<vmem>>, vector<8x16x32xf32>
    %cst_26 = arith.constant dense<0.000000e+00> : vector<8x1x32xf32>
    %34 = tpu.matmul %31, %33, %cst_26 {dimension_numbers = #tpu.dot_dimension_numbers<[2], [1], [1], [2], [0, 0, 0, 1, 1, 2], [0], [0]>} : vector<8x1x16xf32>, vector<8x16x32xf32>, vector<8x1x32xf32> -> vector<8x1x32xf32>
    %c0_27 = arith.constant 0 : index
    %c0_28 = arith.constant 0 : index
    %c0_29 = arith.constant 0 : index
    %35 = vector.load %arg8[%c0_27, %c0_28, %c0_29] : memref<8x1x32xf32, #tpu.memory_space<vmem>>, vector<8x1x32xf32>
    tpu.vector_store %arg8[%c0_27, %c0_28, %c0_29], %34 {strides = array<i32>} : memref<8x1x32xf32, #tpu.memory_space<vmem>>, vector<8x1x32xf32>,
    return
  }
  func.func @transform_0(%arg0: i32) -> (i32, i32, i32) {
    %c0_i32 = arith.constant 0 : i32
    %c0_i32_0 = arith.constant 0 : i32
    %c0_i32_1 = arith.constant 0 : i32
    return %arg0, %c0_i32, %c0_i32_0 : i32, i32, i32
  }
  func.func @transform_1(%arg0: i32) -> (i32, i32, i32) {
    %c0_i32 = arith.constant 0 : i32
    %c0_i32_0 = arith.constant 0 : i32
    %c0_i32_1 = arith.constant 0 : i32
    return %arg0, %c0_i32, %c0_i32_0 : i32, i32, i32
  }
  func.func @transform_2(%arg0: i32) -> (i32, i32, i32) {
    %c0_i32 = arith.constant 0 : i32
    %c0_i32_0 = arith.constant 0 : i32
    %c0_i32_1 = arith.constant 0 : i32
    return %arg0, %c0_i32, %c0_i32_0 : i32, i32, i32
  }
  func.func @transform_3(%arg0: i32) -> (i32, i32, i32) {
    %c0_i32 = arith.constant 0 : i32
    %c0_i32_0 = arith.constant 0 : i32
    %c0_i32_1 = arith.constant 0 : i32
    return %arg0, %c0_i32, %c0_i32_0 : i32, i32, i32
  }
  func.func @transform_4(%arg0: i32) -> (i32, i32, i32) {
    %c0_i32 = arith.constant 0 : i32
    %c0_i32_0 = arith.constant 0 : i32
    %c0_i32_1 = arith.constant 0 : i32
    return %arg0, %c0_i32, %c0_i32_0 : i32, i32, i32
  }
  func.func @transform_5(%arg0: i32) -> (i32, i32) {
    %c0_i32 = arith.constant 0 : i32
    %c0_i32_0 = arith.constant 0 : i32
    %c0_i32_1 = arith.constant 0 : i32
    return %c0_i32, %c0_i32_0 : i32, i32
  }
  func.func @transform_6(%arg0: i32) -> (i32, i32) {
    %c0_i32 = arith.constant 0 : i32
    %c0_i32_0 = arith.constant 0 : i32
    %c0_i32_1 = arith.constant 0 : i32
    return %c0_i32, %c0_i32_0 : i32, i32
  }
  func.func @transform_7(%arg0: i32) -> (i32, i32, i32) {
    %c0_i32 = arith.constant 0 : i32
    %c0_i32_0 = arith.constant 0 : i32
    %c0_i32_1 = arith.constant 0 : i32
    return %arg0, %c0_i32, %c0_i32_0 : i32, i32, i32
  }
  func.func @transform_8(%arg0: i32) -> (i32, i32, i32) {
    %c0_i32 = arith.constant 0 : i32
    %c0_i32_0 = arith.constant 0 : i32
    %c0_i32_1 = arith.constant 0 : i32
    return %arg0, %c0_i32, %c0_i32_0 : i32, i32, i32
  }
}

</mosaic_0001>

<bundles_post_ra>
// kernel: attention_forward.1
= control target key start
LH: loop header
LB: loop body
LE: loop exit
PB: predicated region body
PF: predicated region fallthrough
CT: control target
= control target key end

     0   :  { %14 = vsyncpa [#allocation3], 0  ;;  %s3717_s0 = inlined_call_operand.vmem [shape: f32[16,16,1], index: 0, kind: input, shape index: {}]   ;;  %s3718_s1 = inlined_call_operand.vmem [shape: f32[16,16,16], index: 1, kind: input, shape index: {}]   ;;  %s3719_s2 = inlined_call_operand.vmem [shape: f32[16,10,16], index: 2, kind: input, shape index: {}]   ;;  %s3720_s3 = inlined_call_operand.vmem [shape: f32[16,1,16], index: 3, kind: input, shape index: {}]   ;;  %s3721_s4 = inlined_call_operand.vmem [shape: f32[16,16,32], index: 4, kind: input, shape index: {}]   ;;  %s3722_s5 = inlined_call_operand.vmem [shape: f32[16,10], index: 5, kind: input, shape index: {}]   ;;  %s3723_s6 = inlined_call_operand.vmem [shape: f32[1,16], index: 6, kind: input, shape index: {}]   ;;  %s3724_s7 = inlined_call_operand.hbm [shape: f32[16,1,32], index: 7, kind: output, shape index: {0}]   ;;  %s3725_s8 = inlined_call_operand.hbm [shape: f32[16,1,16], index: 8, kind: output, shape index: {1}]  }
   0x1   :  { %16 = vsyncpa [#allocation3 + $0x1], 0 }
   0x2   :  { %17 = vsyncpa [#allocation5], 0 }
   0x3   :  { %19 = vsyncpa [#allocation5 + $0x1], 0  ;;  %s3259_s27 = smov 0   ;;  %s3261_s28 = smov 0  }
   0x4   :  { %s3263_s29 = smov 0   ;;  %s3265_s30 = smov 0  }
   0x5 LB: > { %s3280_s9 = sadd.s32 4294967295, %s3205_s30   ;;  %s2679_s10 = sadd.s32 4294967294, %s3205_s30   ;;  %s3205_s30 = sphi %s3265_s30, %s3735_s30   ;;  %s3201_s29 = sphi %s3263_s29, %s3734_s29   ;;  %s3197_s28 = sphi %s3261_s28, %s3733_s28   ;;  %s3193_s27 = sphi %s3259_s27, %s3732_s27  }
   0x6   : > { %s3284_s11 = sadd.s32 1, %s3205_s30   ;;  %s204_s12 = sadd.s32 1, %s3201_s29 }
   0x7   : > { %s201_s13 = ssub.s32 %s3205_s30, %s3284_s11  ;;  %p214_p0 = scmp.ne.s32.totalorder %s3201_s29, %s3197_s28 }
   0x8   : > { %p202_p1 = scmp.eq.s32.totalorder %s201_s13, 0  ;;  %p215_p2 = scmp.eq.s32.totalorder %s3280_s9, 1 }
   0x9   : > { %p220_p3 = scmp.ne.s32.totalorder %s3197_s28, %s3193_s27  ;;  %p221_p4 = scmp.eq.s32.totalorder %s2679_s10, 1 }
   0xa   : > { %s3295_s14 = scalar_select %p202_p1, %s3201_s29, %s204_s12  }
   0xb   : > { %p3297_p5 = por %p215_p2, %p214_p0  ;;  %p3301_p6 = por %p221_p4, %p220_p3 }
   0xc   : > { %p2682_p7 = scmp.ge.s32.totalorder %s3205_s30, 1  ;;  %p319_p8 = scmp.lt.s32.totalorder %s3205_s30, 3 }
   0xe   : > { %p320_p9 = pnand %p2682_p7, %p319_p8 }
   0xf   : > { %s2685_s17 = sshll.u32 (!%p320_p9), %s3280_s9, 3  ;;  %s3726_s18 = sshll.u32 (!%p320_p9), %s3280_s9, 7 }
  0x10   : > { %323 = sbr.rel (%p320_p9) target bundleno = 976 (0x3d0), region = 48  ;;  %p382_p10 = scmp.lt.s32.totalorder (!%p320_p9), %s2685_s17, 15 }
  0x11   : > { %s3626_s22 = scalar_lea.hbm (!%p320_p9), %s3725_s8, %s3726_s18 }
  0x15   : > { %v3311_v0 = vld [vmem:[%s3722_s5] sm:$0xff]  ;;  %vm450_vm0 = vcmask 80896   ;;  %v3207_v1 = vmov 0   ;;  %s3737_s17 = smov (!%p382_p10, %s2685_s17), 15  ;;  %vm457_vm1 = vcmask 1041408   ;;  %v417_v6 = vld [vmem:[%s3722_s5 + $0x8] sm:$0xff] }
  0x16   : > { %2836 = vmatprep.mubr.msk.f32.mxu0 %vm450_vm0, %v3311_v0  ;;  %2843 = vmatprep.mubr.msk.f32.mxu1 %vm450_vm0, %v3311_v0  ;;  %s3320_s20 = sshll.u32 %s3737_s17, 4  ;;  %v3208_v35 = vmov 0.0   ;;  %vm3209_vm2 = vmmov 0   ;;  %vm1211_vm3 = vcmask 130048   ;;  %s3490_s25 = scalar_lea.vmem %s3720_s3, %s3737_s17  ;;  %vm1799_vm6 = vcmask 122880  }
  0x17   : > { %3050 = vset.pattern.permute.xlu1 %v3207_v1  ;;  %3049 = vset.pattern.permute.xlu0 %v3207_v1  ;;  %s3326_s23 = scalar_lea.vmem %s3719_s2, %s3320_s20  ;;  %s3379_s12 = scalar_lea.vmem %s3717_s0, %s3320_s20 }
  0x18   : > { %v419_v2 = vld [vmem:[%s3326_s23 + $0x8] sm:$0x3]  ;;  %v421_v3 = vld [vmem:[%s3326_s23 + $0x18] sm:$0x3]  ;;  %v418_v4 = vld [vmem:[%s3326_s23] sm:$0xff]  ;;  %s3415_s19 = scalar_lea.vmem %s3718_s1, %s3320_s20  ;;  %s3538_s10 = scalar_lea.vmem %s3721_s4, %s3320_s20 }
  0x19   : > { %2832 = vmatprep.subr.msk.mxu0 %vm457_vm1, %v419_v2  ;;  %2839 = vmatprep.subr.msk.mxu1 %vm457_vm1, %v421_v3  ;;  %v420_v5 = vld [vmem:[%s3326_s23 + $0x10] sm:$0xff]  ;;  %v423_v7 = vld [vmem:[%s3326_s23 + $0x28] sm:$0x3]  ;;  %v425_v8 = vld [vmem:[%s3326_s23 + $0x38] sm:$0x3]  ;;  %s3549_s20 = sand.u32 1, %s3197_s28  }
  0x1a   : > { %2833 = vmatpush3.msk.msra.mxu0 %vm457_vm1, %v419_v2  ;;  %2840 = vmatpush3.msk.msra.mxu1 %vm457_vm1, %v421_v3  ;;  %v422_v9 = vld [vmem:[%s3326_s23 + $0x20] sm:$0xff]  ;;  %v424_v10 = vld [vmem:[%s3326_s23 + $0x30] sm:$0xff]  ;;  %v427_v11 = vld [vmem:[%s3326_s23 + $0x48] sm:$0x3]  ;;  %s2511_s24 = scalar_lea.sflag [#allocation5], %s3549_s20  ;;  %s3210_s17 = smov [#allocation4]  }
  0x1b   : > { %2834 = vmatprep.subr.mxu0 %v418_v4  ;;  %2841 = vmatprep.subr.mxu1 %v420_v5  ;;  %v429_v12 = vld [vmem:[%s3326_s23 + $0x58] sm:$0x3]  ;;  %v426_v13 = vld [vmem:[%s3326_s23 + $0x40] sm:$0xff]  ;;  %v428_v14 = vld [vmem:[%s3326_s23 + $0x50] sm:$0xff]  ;;  %s3119_s26 = sshll.u32 %s3210_s17, 4  ;;  %s3120_s26 = int_to_ptr.vmem [resolvable:$false] %s3119_s26 }
  0x1c   : > { %2835 = vmatpush3.msra.mxu0 %v418_v4  ;;  %2842 = vmatpush3.msra.mxu1 %v420_v5  ;;  %v431_v15 = vld [vmem:[%s3326_s23 + $0x68] sm:$0x3]  ;;  %v433_v16 = vld [vmem:[%s3326_s23 + $0x78] sm:$0x3]  ;;  %v430_v17 = vld [vmem:[%s3326_s23 + $0x60] sm:$0xff] }
  0x1d   : > { %2837 = vmatmul.mubr.msk.f32.vlgmr.msra.gmra.mxu0 %vm450_vm0, %v417_v6  ;;  %2844 = vmatmul.mubr.msk.f32.vlgmr.msra.gmra.mxu1 %vm450_vm0, %v417_v6  ;;  %v432_v18 = vld [vmem:[%s3326_s23 + $0x70] sm:$0xff]  ;;  %v1083_v19 = vld [vmem:[%s3379_s12 + $0x8] sm:$0xff]  ;;  %v1082_v20 = vld [vmem:[%s3379_s12] sm:$0xff] }
  0x1e   : > { %2846 = vmatprep.subr.msk.mxu0 %vm457_vm1, %v423_v7  ;;  %2853 = vmatprep.subr.msk.mxu1 %vm457_vm1, %v425_v8  ;;  %v1085_v21 = vld [vmem:[%s3379_s12 + $0x18] sm:$0xff]  ;;  %v1084_v22 = vld [vmem:[%s3379_s12 + $0x10] sm:$0xff]  ;;  %v1087_v23 = vld [vmem:[%s3379_s12 + $0x28] sm:$0xff] }
  0x1f   : > { %2847 = vmatpush3.msk.msra.mxu0 %vm457_vm1, %v423_v7  ;;  %2854 = vmatpush3.msk.msra.mxu1 %vm457_vm1, %v425_v8  ;;  %v1089_v24 = vld [vmem:[%s3379_s12 + $0x38] sm:$0xff]  ;;  %v1086_v25 = vld [vmem:[%s3379_s12 + $0x20] sm:$0xff]  ;;  %v1088_v26 = vld [vmem:[%s3379_s12 + $0x30] sm:$0xff] }
  0x20   : > { %2848 = vmatprep.subr.mxu0 %v422_v9  ;;  %2855 = vmatprep.subr.mxu1 %v424_v10  ;;  %v1091_v27 = vld [vmem:[%s3379_s12 + $0x48] sm:$0xff]  ;;  %v1093_v28 = vld [vmem:[%s3379_s12 + $0x58] sm:$0xff]  ;;  %v1090_v29 = vld [vmem:[%s3379_s12 + $0x40] sm:$0xff] }
  0x21   : > { %2849 = vmatpush3.msra.mxu0 %v422_v9  ;;  %2850 = vmatprep.mubr.msk.f32.mxu0 %vm450_vm0, %v3311_v0  ;;  %v1092_v30 = vld [vmem:[%s3379_s12 + $0x50] sm:$0xff]  ;;  %v1095_v31 = vld [vmem:[%s3379_s12 + $0x68] sm:$0xff]  ;;  %v1097_v32 = vld [vmem:[%s3379_s12 + $0x78] sm:$0xff] }
  0x22   : > { %2856 = vmatpush3.msra.mxu1 %v424_v10  ;;  %2857 = vmatprep.mubr.msk.f32.mxu1 %vm450_vm0, %v3311_v0  ;;  %v1094_v33 = vld [vmem:[%s3379_s12 + $0x60] sm:$0xff]  ;;  %v1096_v34 = vld [vmem:[%s3379_s12 + $0x70] sm:$0xff]  ;;  %v435_v44 = vld [vmem:[%s3415_s19 + $0x8] sm:$0xff]  ;;  %s3727_s12 = sshll.u32 %s3549_s20, 3 }
  0x23   : > { %2851 = vmatmul.mubr.msk.f32.vlgmr.msra.gmra.mxu0 %vm450_vm0, %v417_v6  ;;  %2858 = vmatmul.mubr.msk.f32.vlgmr.msra.gmra.mxu1 %vm450_vm0, %v417_v6  ;;  %v437_v45 = vld [vmem:[%s3415_s19 + $0x18] sm:$0xff]  ;;  %v434_v48 = vld [vmem:[%s3415_s19] sm:$0xff]  ;;  %v436_v49 = vld [vmem:[%s3415_s19 + $0x10] sm:$0xff]  ;;  %s3555_s13 = scalar_lea.vmem [#allocation4], %s3727_s12 }
  0x24   : > { %2860 = vmatprep.subr.msk.mxu0 %vm457_vm1, %v427_v11  ;;  %2867 = vmatprep.subr.msk.mxu1 %vm457_vm1, %v429_v12  ;;  %v439_v60 = vld [vmem:[%s3415_s19 + $0x28] sm:$0xff]  ;;  %v441_v61 = vld [vmem:[%s3415_s19 + $0x38] sm:$0xff]  ;;  %v438_v2 = vld [vmem:[%s3415_s19 + $0x20] sm:$0xff]  ;;  %s2540_s23 = sshll.u32 %s3555_s13, 4  ;;  %s3629_s23 = int_to_ptr.vmem [resolvable:$true] %s2540_s23 }
  0x25   : > { %2861 = vmatpush3.msk.msra.mxu0 %vm457_vm1, %v427_v11  ;;  %2868 = vmatpush3.msk.msra.mxu1 %vm457_vm1, %v429_v12  ;;  %v440_v3 = vld [vmem:[%s3415_s19 + $0x30] sm:$0xff]  ;;  %p3122_p0 = scmp.lt.s32.totalorder %s3629_s23, %s3120_s26 }
  0x26   : > { %2862 = vmatprep.subr.mxu0 %v426_v13  ;;  %2869 = vmatprep.subr.mxu1 %v428_v14 }
  0x27   : > { %2863 = vmatpush3.msra.mxu0 %v426_v13  ;;  %2864 = vmatprep.mubr.msk.f32.mxu0 %vm450_vm0, %v3311_v0 }
  0x28   : > { %2870 = vmatpush3.msra.mxu1 %v428_v14  ;;  %2871 = vmatprep.mubr.msk.f32.mxu1 %vm450_vm0, %v3311_v0  ;;  %v443_v14 = vld [vmem:[%s3415_s19 + $0x48] sm:$0xff] }
  0x29   : > { %2865 = vmatmul.mubr.msk.f32.vlgmr.msra.gmra.mxu0 %vm450_vm0, %v417_v6  ;;  %2872 = vmatmul.mubr.msk.f32.vlgmr.msra.gmra.mxu1 %vm450_vm0, %v417_v6 }
  0x2a   : > { %2874 = vmatprep.subr.msk.mxu0 %vm457_vm1, %v431_v15  ;;  %2881 = vmatprep.subr.msk.mxu1 %vm457_vm1, %v433_v16 }
  0x2b   : > { %2875 = vmatpush3.msk.msra.mxu0 %vm457_vm1, %v431_v15  ;;  %2882 = vmatpush3.msk.msra.mxu1 %vm457_vm1, %v433_v16  ;;  %v445_v15 = vld [vmem:[%s3415_s19 + $0x58] sm:$0xff] }
  0x2c   : > { %2876 = vmatprep.subr.mxu0 %v430_v17  ;;  %2883 = vmatprep.subr.mxu1 %v432_v18 }
  0x2d   : > { %2877 = vmatpush3.msra.mxu0 %v430_v17  ;;  %2878 = vmatprep.mubr.msk.f32.mxu0 %vm450_vm0, %v3311_v0 }
  0x2e   : > { %2884 = vmatpush3.msra.mxu1 %v432_v18  ;;  %2885 = vmatprep.mubr.msk.f32.mxu1 %vm450_vm0, %v3311_v0 }
  0x2f   : > { %2879 = vmatmul.mubr.msk.f32.vlgmr.msra.gmra.mxu0 %vm450_vm0, %v417_v6  ;;  %2886 = vmatmul.mubr.msk.f32.vlgmr.msra.gmra.mxu1 %vm450_vm0, %v417_v6 }
  0x30   : > { %1105 = vperm.xlu0 %3049, %v1083_v19   ;;  %1100 = vperm.xlu1 %3050, %v1082_v20   ;;  %v442_v20 = vld [vmem:[%s3415_s19 + $0x40] sm:$0xff] }
  0x31   : > { %2888 = vmatprep.subr.mxu0 %v3208_v35  ;;  %2895 = vmatprep.subr.mxu1 %v3208_v35 }
  0x32   : > { %2892 = vmatprep.mubr.msk.f32.mxu0 %vm3209_vm2, %v3208_v35  ;;  %2899 = vmatprep.mubr.msk.f32.mxu1 %vm3209_vm2, %v3208_v35 }
  0x34   : > { %1115 = vperm.xlu0 %3049, %v1085_v21   ;;  %1110 = vperm.xlu1 %3050, %v1084_v22   ;;  %v444_v21 = vld [vmem:[%s3415_s19 + $0x50] sm:$0xff] }
  0x38   : > { %1125 = vperm.xlu0 %3049, %v1087_v23   ;;  %1135 = vperm.xlu1 %3050, %v1089_v24  }
  0x3c   : > { %1120 = vperm.xlu0 %3049, %v1086_v25   ;;  %1130 = vperm.xlu1 %3050, %v1088_v26  }
  0x40   : > { %1145 = vperm.xlu0 %3049, %v1091_v27   ;;  %1155 = vperm.xlu1 %3050, %v1093_v28  }
  0x44   : > { %1140 = vperm.xlu0 %3049, %v1090_v29   ;;  %1150 = vperm.xlu1 %3050, %v1092_v30  }
  0x48   : > { %1165 = vperm.xlu0 %3049, %v1095_v31   ;;  %1175 = vperm.xlu1 %3050, %v1097_v32   ;;  %v447_v32 = vld [vmem:[%s3415_s19 + $0x68] sm:$0xff] }
  0x4c   : > { %1160 = vperm.xlu0 %3049, %v1094_v33   ;;  %1170 = vperm.xlu1 %3050, %v1096_v34   ;;  %v449_v33 = vld [vmem:[%s3415_s19 + $0x78] sm:$0xff] }
  0xab   : > { %v1106_v36 = vpop.permute.xlu0 %1105  ;;  %v1101_v37 = vpop.permute.xlu1 %1100 }
  0xaf   : > { %v1116_v38 = vpop.permute.xlu0 %1115  ;;  %v1111_v39 = vpop.permute.xlu1 %1110 }
  0xb3   : > { %v1126_v40 = vpop.permute.xlu0 %1125  ;;  %v1136_v41 = vpop.permute.xlu1 %1135 }
  0xb7   : > { %v1121_v42 = vpop.permute.xlu0 %1120  ;;  %v1131_v43 = vpop.permute.xlu1 %1130 }
  0xbb   : > { %v1146_v58 = vpop.permute.xlu0 %1145  ;;  %v1156_v59 = vpop.permute.xlu1 %1155 }
  0xbf   : > { %v1141_v12 = vpop.permute.xlu0 %1140  ;;  %v1151_v13 = vpop.permute.xlu1 %1150 }
  0xc3   : > { %v1166_v30 = vpop.permute.xlu0 %1165  ;;  %v1176_v31 = vpop.permute.xlu1 %1175 }
  0xdd   : > { %v2838_v46 = vpop.f32.mrf.mxu0  ;;  %v2845_v47 = vpop.f32.mrf.mxu1 }
  0xde   : > { %v533_v50 = vadd.f32 %v2838_v46, %v435_v44  ;;  %v611_v51 = vadd.f32 %v2845_v47, %v437_v45 }
  0xdf   : > { %v527_v52 = vpop.f32.mrf.mxu0  ;;  %v605_v53 = vpop.f32.mrf.mxu1 }
  0xe0   : > { %v1179_v54 = vadd.f32 %v1106_v36, %v533_v50  ;;  %v1181_v55 = vadd.f32 %v1116_v38, %v611_v51  ;;  %v528_v56 = vadd.f32 %v527_v52, %v434_v48  ;;  %v606_v57 = vadd.f32 %v605_v53, %v436_v49  ;;  %v3437_v48 = vld [vmem:[%s3723_s6] sm:$0x1] }
  0xe2   : > { %3051 = vtanh.f32 %v1179_v54  ;;  %v1178_v62 = vadd.f32 %v1101_v37, %v528_v56  ;;  %v1180_v63 = vadd.f32 %v1111_v39, %v606_v57  ;;  %v1161_v54 = vpop.permute.xlu0 %1160 }
  0xe3   : > { %3053 = vtanh.f32 %v1181_v55  ;;  %v2852_v0 = vpop.f32.mrf.mxu0  ;;  %v2859_v1 = vpop.f32.mrf.mxu1 }
  0xe4   : > { %3055 = vtanh.f32 %v1178_v62  ;;  %v689_v4 = vadd.f32 %v2852_v0, %v439_v60  ;;  %v767_v5 = vadd.f32 %v2859_v1, %v441_v61  ;;  %v1171_v55 = vpop.permute.xlu1 %1170 }
  0xe5   : > { %3057 = vtanh.f32 %v1180_v63  ;;  %v683_v6 = vpop.f32.mrf.mxu0  ;;  %v761_v7 = vpop.f32.mrf.mxu1 }
  0xe6   : > { %v1183_v8 = vadd.f32 %v1126_v40, %v689_v4  ;;  %v1185_v9 = vadd.f32 %v1136_v41, %v767_v5  ;;  %v684_v10 = vadd.f32 %v683_v6, %v438_v2  ;;  %v762_v11 = vadd.f32 %v761_v7, %v440_v3  ;;  %v446_v40 = vld [vmem:[%s3415_s19 + $0x60] sm:$0xff]  ;;  %v448_v41 = vld [vmem:[%s3415_s19 + $0x70] sm:$0xff] }
  0xe7   : > { %v1775_v6 = vld [vmem:[%s3490_s25] sm:$0x1]  ;;  %v1776_v7 = vld [vmem:[%s3490_s25 + $0x1] sm:$0x1] }
  0xe8   : > { %3059 = vtanh.f32 %v1183_v8  ;;  %v1182_v16 = vadd.f32 %v1121_v42, %v684_v10  ;;  %v1184_v17 = vadd.f32 %v1131_v43, %v762_v11  ;;  %vm1783_vm4 = vcmp.ne.f32.partialorder %v1775_v6, 0.0  ;;  %v1777_v10 = vld [vmem:[%s3490_s25 + $0x2] sm:$0x1] }
  0xe9   : > { %3061 = vtanh.f32 %v1185_v9  ;;  %v2866_v18 = vpop.f32.mrf.mxu0  ;;  %v2873_v19 = vpop.f32.mrf.mxu1  ;;  %vm1784_vm5 = vcmp.ne.f32.partialorder %v1776_v7, 0.0  ;;  %vm1785_vm7 = vcmp.ne.f32.partialorder %v1777_v10, 0.0 }
  0xea   : > { %3063 = vtanh.f32 %v1182_v16  ;;  %v845_v22 = vadd.f32 %v2866_v18, %v443_v14  ;;  %v923_v23 = vadd.f32 %v2873_v19, %v445_v15 }
  0xeb   : > { %3065 = vtanh.f32 %v1184_v17  ;;  %v839_v24 = vpop.f32.mrf.mxu0  ;;  %v917_v25 = vpop.f32.mrf.mxu1  ;;  %v1778_v17 = vld [vmem:[%s3490_s25 + $0x3] sm:$0x1] }
  0xec   : > { %v1187_v26 = vadd.f32 %v1146_v58, %v845_v22  ;;  %v1189_v27 = vadd.f32 %v1156_v59, %v923_v23  ;;  %v840_v28 = vadd.f32 %v839_v24, %v442_v20  ;;  %v918_v29 = vadd.f32 %v917_v25, %v444_v21  ;;  %v1779_v20 = vld [vmem:[%s3490_s25 + $0x4] sm:$0x1]  ;;  %v1780_v25 = vld [vmem:[%s3490_s25 + $0x5] sm:$0x1] }
  0xed   : > { %vm1786_vm8 = vcmp.ne.f32.partialorder %v1778_v17, 0.0  ;;  %vm1787_vm9 = vcmp.ne.f32.partialorder %v1779_v20, 0.0  ;;  %vm1788_vm10 = vcmp.ne.f32.partialorder %v1780_v25, 0.0  ;;  %v1896_v25 = vld [vmem:[%s3538_s10] sm:$0xff] }
  0xee   : > { %3067 = vtanh.f32 %v1187_v26  ;;  %v1186_v34 = vadd.f32 %v1141_v12, %v840_v28  ;;  %v1188_v36 = vadd.f32 %v1151_v13, %v918_v29 }
  0xef   : > { %v3052_v37 = vpop.eup %3051  ;;  %3069 = vtanh.f32 %v1189_v27  ;;  %v2880_v38 = vpop.f32.mrf.mxu0 }
  0xf0   : > { %v2887_v39 = vpop.f32.mrf.mxu1  ;;  %v3054_v42 = vpop.eup %3053  ;;  %3071 = vtanh.f32 %v1186_v34  ;;  %v1001_v43 = vadd.f32 %v2880_v38, %v447_v32  ;;  %2889 = vmatpush3.msra.mxu0 %v3052_v37 }
  0xf1   : > { %v1079_v44 = vadd.f32 %v2887_v39, %v449_v33  ;;  %v3056_v45 = vpop.eup %3055  ;;  %3073 = vtanh.f32 %v1188_v36  ;;  %v995_v46 = vpop.f32.mrf.mxu0  ;;  %2896 = vmatpush3.msra.mxu1 %v3054_v42  ;;  %2890 = vmatprep.subr.mxu0 %v3208_v35  ;;  %v1782_v36 = vld [vmem:[%s3490_s25 + $0x7] sm:$0x1] }
  0xf2   : > { %v1073_v47 = vpop.f32.mrf.mxu1  ;;  %v3058_v49 = vpop.eup %3057  ;;  %v1191_v50 = vadd.f32 %v1166_v30, %v1001_v43  ;;  %v996_v52 = vadd.f32 %v995_v46, %v446_v40  ;;  %2897 = vmatprep.subr.mxu1 %v3208_v35  ;;  %2891 = vmatpush3.msra.mxu0 %v3056_v45  ;;  %v1781_v30 = vld [vmem:[%s3490_s25 + $0x6] sm:$0x1]  ;;  %vm1790_vm12 = vcmp.ne.f32.partialorder %v1782_v36, 0.0  ;;  %s3115_s25 = scalar_lea.vmem %s3629_s23, 128 }
  0xf3   : > { %v1193_v51 = vadd.f32 %v1176_v31, %v1079_v44  ;;  %v1074_v53 = vadd.f32 %v1073_v47, %v448_v41  ;;  %2898 = vmatpush3.msra.mxu1 %v3058_v49  ;;  %2893 = vmatmul.mubr.msk.f32.vlgmr.msra.gmra.mxu0 %vm1211_vm3, %v3437_v48  ;;  %vm1789_vm11 = vcmp.ne.f32.partialorder %v1781_v30, 0.0  ;;  %p3116_p11 = scmp.ne.s32.totalorder %s3629_s23, %s3115_s25 }
  0xf4   : > { %3075 = vtanh.f32 %v1191_v50  ;;  %v1190_v56 = vadd.f32 %v1161_v54, %v996_v52  ;;  %2900 = vmatmul.mubr.msk.f32.vlgmr.msra.gmra.mxu1 %vm1211_vm3, %v3437_v48  ;;  %2902 = vmatprep.subr.mxu0 %v3208_v35 }
  0xf5   : > { %v1192_v57 = vadd.f32 %v1171_v55, %v1074_v53  ;;  %v3060_v58 = vpop.eup %3059  ;;  %3077 = vtanh.f32 %v1193_v51  ;;  %2909 = vmatprep.subr.mxu1 %v3208_v35  ;;  %2906 = vmatprep.mubr.msk.f32.mxu0 %vm3209_vm2, %v3208_v35  ;;  %p3117_p12 = pnand %p3116_p11, %p3297_p5 }
  0xf6   : > { %v3062_v59 = vpop.eup %3061  ;;  %3079 = vtanh.f32 %v1190_v56  ;;  %2903 = vmatpush3.msra.mxu0 %v3060_v58  ;;  %2913 = vmatprep.mubr.msk.f32.mxu1 %vm3209_vm2, %v3208_v35 }
  0xf7   : > { %v3064_v60 = vpop.eup %3063  ;;  %3081 = vtanh.f32 %v1192_v57  ;;  %2910 = vmatpush3.msra.mxu1 %v3062_v59  ;;  %2904 = vmatprep.subr.mxu0 %v3208_v35  ;;  %p3118_p13 = pneg %p3117_p12 }
  0xf8   : > { %v3066_v61 = vpop.eup %3065  ;;  %2911 = vmatprep.subr.mxu1 %v3208_v35  ;;  %2905 = vmatpush3.msra.mxu0 %v3064_v60 }
  0xf9   : > { %2912 = vmatpush3.msra.mxu1 %v3066_v61  ;;  %2907 = vmatmul.mubr.msk.f32.vlgmr.msra.gmra.mxu0 %vm1211_vm3, %v3437_v48 }
  0xfa   : > { %2916 = vmatprep.subr.mxu0 %v3208_v35  ;;  %2923 = vmatprep.subr.mxu1 %v3208_v35 }
  0xfb   : > { %v3068_v62 = vpop.eup %3067  ;;  %2914 = vmatmul.mubr.msk.f32.vlgmr.msra.gmra.mxu1 %vm1211_vm3, %v3437_v48  ;;  %2920 = vmatprep.mubr.msk.f32.mxu0 %vm3209_vm2, %v3208_v35 }
  0xfc   : > { %v3070_v63 = vpop.eup %3069  ;;  %2917 = vmatpush3.msra.mxu0 %v3068_v62  ;;  %2927 = vmatprep.mubr.msk.f32.mxu1 %vm3209_vm2, %v3208_v35 }
  0xfd   : > { %v3072_v0 = vpop.eup %3071  ;;  %2924 = vmatpush3.msra.mxu1 %v3070_v63  ;;  %2918 = vmatprep.subr.mxu0 %v3208_v35 }
  0xfe   : > { %v3074_v1 = vpop.eup %3073  ;;  %2925 = vmatprep.subr.mxu1 %v3208_v35  ;;  %2919 = vmatpush3.msra.mxu0 %v3072_v0 }
  0xff   : > { %2926 = vmatpush3.msra.mxu1 %v3074_v1  ;;  %2921 = vmatmul.mubr.msk.f32.vlgmr.msra.gmra.mxu0 %vm1211_vm3, %v3437_v48 }
 0x100   : > { %2930 = vmatprep.subr.mxu0 %v3208_v35  ;;  %2937 = vmatprep.subr.mxu1 %v3208_v35 }
 0x101   : > { %v3076_v2 = vpop.eup %3075  ;;  %2928 = vmatmul.mubr.msk.f32.vlgmr.msra.gmra.mxu1 %vm1211_vm3, %v3437_v48  ;;  %2934 = vmatprep.mubr.msk.f32.mxu0 %vm3209_vm2, %v3208_v35 }
 0x102   : > { %v3078_v3 = vpop.eup %3077  ;;  %2931 = vmatpush3.msra.mxu0 %v3076_v2  ;;  %2941 = vmatprep.mubr.msk.f32.mxu1 %vm3209_vm2, %v3208_v35 }
 0x103   : > { %v3080_v4 = vpop.eup %3079  ;;  %2938 = vmatpush3.msra.mxu1 %v3078_v3  ;;  %2932 = vmatprep.subr.mxu0 %v3208_v35 }
 0x104   : > { %v3082_v5 = vpop.eup %3081  ;;  %2939 = vmatprep.subr.mxu1 %v3208_v35  ;;  %2933 = vmatpush3.msra.mxu0 %v3080_v4 }
 0x105   : > { %2940 = vmatpush3.msra.mxu1 %v3082_v5  ;;  %2935 = vmatmul.mubr.msk.f32.vlgmr.msra.gmra.mxu0 %vm1211_vm3, %v3437_v48 }
 0x106   : > { %2944 = vmatprep.subr.mxu0 %v3208_v35  ;;  %2942 = vmatmul.mubr.msk.f32.vlgmr.msra.gmra.mxu1 %vm1211_vm3, %v3437_v48 }
 0x107   : > { %2951 = vmatprep.subr.mxu1 %v3208_v35  ;;  %2948 = vmatprep.mubr.msk.f32.mxu0 %vm3209_vm2, %v3208_v35 }
 0x108   : > { %2955 = vmatprep.mubr.msk.f32.mxu1 %vm3209_vm2, %v3208_v35 }
 0x1b3   : > { %v1281_v8 = vpop.f32.mrf.mxu0 }
 0x1b4   : > { %v1351_v9 = vpop.f32.mrf.mxu1  ;;  %v1791_v11 = vsel %vm1783_vm4, -1e+30, %v1281_v8 }
 0x1b5   : > { %v1792_v12 = vsel %vm1784_vm5, -1e+30, %v1351_v9  ;;  %v2894_v13 = vpop.f32.mrf.mxu0  ;;  %v1800_v14 = vsel %vm1799_vm6, %v1791_v11, -inf }
 0x1b6   : > { %v1803_v15 = vsel %vm1799_vm6, %v1792_v12, -inf  ;;  %v2901_v16 = vpop.f32.mrf.mxu1  ;;  %1801 = vmax.xlane.f32.xlu0 %v1800_v14 }
 0x1b7   : > { %1804 = vmax.xlane.f32.xlu1 %v1803_v15 }
 0x1b9   : > { %v1421_v18 = vpop.f32.mrf.mxu0 }
 0x1ba   : > { %v1793_v19 = vsel %vm1785_vm7, -1e+30, %v1421_v18 }
 0x1bb   : > { %v2908_v21 = vpop.f32.mrf.mxu0  ;;  %v1806_v22 = vsel %vm1799_vm6, %v1793_v19, -inf  ;;  %v1491_v23 = vpop.f32.mrf.mxu1 }
 0x1bc   : > { %1807 = vmax.xlane.f32.xlu0 %v1806_v22  ;;  %v1794_v24 = vsel %vm1786_vm8, -1e+30, %v1491_v23  ;;  %v1897_v23 = vld [vmem:[%s3538_s10 + $0x8] sm:$0xff] }
 0x1bd   : > { %v2915_v26 = vpop.f32.mrf.mxu1  ;;  %v1809_v27 = vsel %vm1799_vm6, %v1794_v24, -inf  ;;  %2945 = vmatpush3.msra.mxu0 %v1897_v23 }
 0x1be   : > { %v1898_v26 = vld [vmem:[%s3538_s10 + $0x10] sm:$0xff]  ;;  %2946 = vmatprep.subr.mxu0 %v3208_v35 }
 0x1bf   : > { %v1561_v28 = vpop.f32.mrf.mxu0  ;;  %2947 = vmatpush3.msra.mxu0 %v1896_v25 }
 0x1c0   : > { %v1795_v29 = vsel %vm1787_vm9, -1e+30, %v1561_v28  ;;  %1810 = vmax.xlane.f32.xlu0 %v1809_v27  ;;  %2958 = vmatprep.subr.mxu0 %v3208_v35 }
 0x1c1   : > { %v2922_v31 = vpop.f32.mrf.mxu0  ;;  %v1812_v32 = vsel %vm1799_vm6, %v1795_v29, -inf  ;;  %v1631_v33 = vpop.f32.mrf.mxu1 }
 0x1c2   : > { %1813 = vmax.xlane.f32.xlu1 %v1812_v32  ;;  %v1796_v34 = vsel %vm1788_vm10, -1e+30, %v1631_v33 }
 0x1c3   : > { %v2929_v37 = vpop.f32.mrf.mxu1  ;;  %v1815_v38 = vsel %vm1799_vm6, %v1796_v34, -inf }
 0x1c4   : > { %1816 = vmax.xlane.f32.xlu0 %v1815_v38  ;;  %v1901_v37 = vld [vmem:[%s3538_s10 + $0x28] sm:$0xff] }
 0x1c5   : > { %v1701_v39 = vpop.f32.mrf.mxu0 }
 0x1c6   : > { %v1797_v40 = vsel %vm1789_vm11, -1e+30, %v1701_v39  ;;  %v1771_v42 = vpop.f32.mrf.mxu1 }
 0x1c7   : > { %v1818_v41 = vsel %vm1799_vm6, %v1797_v40, -inf  ;;  %v2936_v43 = vpop.f32.mrf.mxu0  ;;  %v1798_v44 = vsel %vm1790_vm12, -1e+30, %v1771_v42 }
 0x1c8   : > { %1819 = vmax.xlane.f32.xlu1 %v1818_v41  ;;  %v2943_v45 = vpop.f32.mrf.mxu1  ;;  %v1821_v46 = vsel %vm1799_vm6, %v1798_v44, -inf  ;;  %v1903_v41 = vld [vmem:[%s3538_s10 + $0x38] sm:$0xff] }
 0x1c9   : > { %1822 = vmax.xlane.f32.xlu0 %v1821_v46  ;;  %v1905_v46 = vld [vmem:[%s3538_s10 + $0x48] sm:$0xff] }
 0x23f   : > { %v1802_v47 = vpop.xlane.xlu0 %1801 }
 0x240   : > { %v1805_v48 = vpop.xlane.xlu1 %1804  ;;  %v1824_v49 = vsub.f32 %v1791_v11, %v1802_v47  ;;  %v1904_v47 = vld [vmem:[%s3538_s10 + $0x40] sm:$0xff] }
 0x241   : > { %v1825_v50 = vsub.f32 %v1792_v12, %v1805_v48 }
 0x242   : > { %v1832_v51 = vmul.f32 1.442695, %v1824_v49 }
 0x243   : > { %v1834_v52 = vmul.f32 1.442695, %v1825_v50  ;;  %v1907_v50 = vld [vmem:[%s3538_s10 + $0x58] sm:$0xff] }
 0x244   : > { %3083 = vpow2.f32 %v1832_v51 }
 0x245   : > { %v1808_v53 = vpop.xlane.xlu0 %1807  ;;  %3085 = vpow2.f32 %v1834_v52 }
 0x246   : > { %v1826_v54 = vsub.f32 %v1793_v19, %v1808_v53  ;;  %v1909_v53 = vld [vmem:[%s3538_s10 + $0x68] sm:$0xff] }
 0x248   : > { %v1836_v55 = vmul.f32 1.442695, %v1826_v54  ;;  %v1906_v54 = vld [vmem:[%s3538_s10 + $0x50] sm:$0xff] }
 0x249   : > { %v1811_v56 = vpop.xlane.xlu0 %1810 }
 0x24a   : > { %3087 = vpow2.f32 %v1836_v55  ;;  %v1827_v57 = vsub.f32 %v1794_v24, %v1811_v56  ;;  %v1899_v24 = vld [vmem:[%s3538_s10 + $0x18] sm:$0xff]  ;;  %v1908_v56 = vld [vmem:[%s3538_s10 + $0x60] sm:$0xff] }
 0x24b   : > { %v1814_v58 = vpop.xlane.xlu1 %1813  ;;  %2952 = vmatpush3.msra.mxu1 %v1899_v24 }
 0x24c   : > { %v1838_v59 = vmul.f32 1.442695, %v1827_v57  ;;  %v1828_v60 = vsub.f32 %v1795_v29, %v1814_v58  ;;  %2953 = vmatprep.subr.mxu1 %v3208_v35  ;;  %v1911_v58 = vld [vmem:[%s3538_s10 + $0x78] sm:$0xff] }
 0x24d   : > { %v1817_v61 = vpop.xlane.xlu0 %1816  ;;  %2954 = vmatpush3.msra.mxu1 %v1898_v26 }
 0x24e   : > { %3089 = vpow2.f32 %v1838_v59  ;;  %v1840_v62 = vmul.f32 1.442695, %v1828_v60  ;;  %v1829_v63 = vsub.f32 %v1796_v34, %v1817_v61  ;;  %2965 = vmatprep.subr.mxu1 %v3208_v35  ;;  %v1910_v61 = vld [vmem:[%s3538_s10 + $0x70] sm:$0xff] }
 0x250   : > { %3091 = vpow2.f32 %v1840_v62  ;;  %v1842_v0 = vmul.f32 1.442695, %v1829_v63 }
 0x251   : > { %v1820_v1 = vpop.xlane.xlu1 %1819  ;;  %v3084_v2 = vpop.eup %3083 }
 0x252   : > { %3093 = vpow2.f32 %v1842_v0  ;;  %v1830_v3 = vsub.f32 %v1797_v40, %v1820_v1  ;;  %v3086_v4 = vpop.eup %3085  ;;  %v1823_v5 = vpop.xlane.xlu0 %1822  ;;  %v1848_v6 = vsel %vm1799_vm6, %v3084_v2, 0.0  ;;  %v1900_v40 = vld [vmem:[%s3538_s10 + $0x20] sm:$0xff] }
 0x253   : > { %v1831_v8 = vsub.f32 %v1798_v44, %v1823_v5  ;;  %1849 = vadd.xlane.f32.xlu1 %v1848_v6  ;;  %v1851_v9 = vsel %vm1799_vm6, %v3086_v4, 0.0  ;;  %v1902_v44 = vld [vmem:[%s3538_s10 + $0x30] sm:$0xff]  ;;  %s3121_s10 = scalar_lea.vmem %s3120_s26, 256 }
 0x254   : > { %v1844_v7 = vmul.f32 1.442695, %v1830_v3  ;;  %1852 = vadd.xlane.f32.xlu0 %v1851_v9  ;;  %p3123_p1 = scmp.lt.s32.totalorder %s3121_s10, %s3115_s25 }
 0x255   : > { %v1846_v10 = vmul.f32 1.442695, %v1831_v8 }
 0x256   : > { %3095 = vpow2.f32 %v1844_v7  ;;  %p3124_p2 = por %p3123_p1, %p3122_p0 }
 0x257   : > { %v3510_v11 = vpop.eup %3087  ;;  %3097 = vpow2.f32 %v1846_v10 }
 0x258   : > { %v1854_v12 = vsel %vm1799_vm6, %v3510_v11, 0.0  ;;  %p3125_p3 = pnand %p3124_p2, %p3118_p13 }
 0x259   : > { %1855 = vadd.xlane.f32.xlu1 %v1854_v12 }
 0x25b   : > { %v3514_v13 = vpop.eup %3089 }
 0x25c   : > { %v1857_v14 = vsel %vm1799_vm6, %v3514_v13, 0.0 }
 0x25d   : > { %v3518_v15 = vpop.eup %3091  ;;  %1858 = vadd.xlane.f32.xlu0 %v1857_v14 }
 0x25e   : > { %v1860_v16 = vsel %vm1799_vm6, %v3518_v15, 0.0 }
 0x25f   : > { %v3522_v17 = vpop.eup %3093  ;;  %1861 = vadd.xlane.f32.xlu1 %v1860_v16 }
 0x260   : > { %v1863_v18 = vsel %vm1799_vm6, %v3522_v17, 0.0 }
 0x261   : > { %1864 = vadd.xlane.f32.xlu0 %v1863_v18 }
 0x263   : > { %v3526_v19 = vpop.eup %3095 }
 0x264   : > { %v1866_v20 = vsel %vm1799_vm6, %v3526_v19, 0.0  ;;  %v3530_v21 = vpop.eup %3097 }
 0x265   : > { %1867 = vadd.xlane.f32.xlu1 %v1866_v20  ;;  %v1869_v22 = vsel %vm1799_vm6, %v3530_v21, 0.0 }
 0x266   : > { %1870 = vadd.xlane.f32.xlu0 %v1869_v22 }
 0x2dc   : > { %v1850_v27 = vpop.xlane.xlu1 %1849 }
 0x2dd   : > { %v1853_v28 = vpop.xlane.xlu0 %1852  ;;  %3099 = vrcp.f32 %v1850_v27 }
 0x2de   : > { %3101 = vrcp.f32 %v1853_v28 }
 0x2e2   : > { %v1856_v29 = vpop.xlane.xlu1 %1855 }
 0x2e3   : > { %3103 = vrcp.f32 %v1856_v29 }
 0x2e6   : > { %v1859_v30 = vpop.xlane.xlu0 %1858 }
 0x2e7   : > { %3105 = vrcp.f32 %v1859_v30 }
 0x2e8   : > { %v1862_v31 = vpop.xlane.xlu1 %1861 }
 0x2e9   : > { %3107 = vrcp.f32 %v1862_v31 }
 0x2ea   : > { %v1865_v32 = vpop.xlane.xlu0 %1864  ;;  %v3100_v33 = vpop.eup %3099 }
 0x2eb   : > { %3109 = vrcp.f32 %v1865_v32  ;;  %v3102_v34 = vpop.eup %3101  ;;  %v1880_v36 = vmul.f32 %v3100_v33, %v3084_v2 }
 0x2ec   : > { %v1881_v38 = vmul.f32 %v3102_v34, %v3086_v4 }
 0x2ed   : > { %1888 = vst.msk [vmem:[%s3555_s13] sm:$0x1] %vm1799_vm6, %v1880_v36  ;;  %2949 = vmatmul.mubr.msk.f32.vlgmr.msra.gmra.mxu0 %vm1211_vm3, %v1880_v36 }
 0x2ee   : > { %v1868_v39 = vpop.xlane.xlu1 %1867  ;;  %1889 = vst.msk [vmem:[%s3555_s13 + $0x1] sm:$0x1] %vm1799_vm6, %v1881_v38  ;;  %2956 = vmatmul.mubr.msk.f32.vlgmr.msra.gmra.mxu1 %vm1211_vm3, %v1881_v38  ;;  %2959 = vmatpush3.msra.mxu0 %v1901_v37 }
 0x2ef   : > { %3111 = vrcp.f32 %v1868_v39  ;;  %v1871_v43 = vpop.xlane.xlu0 %1870  ;;  %2960 = vmatprep.subr.mxu0 %v3208_v35  ;;  %2962 = vmatprep.mubr.msk.f32.mxu0 %vm3209_vm2, %v3208_v35 }
 0x2f0   : > { %v3104_v42 = vpop.eup %3103  ;;  %3113 = vrcp.f32 %v1871_v43  ;;  %2961 = vmatpush3.msra.mxu0 %v1900_v40  ;;  %2966 = vmatpush3.msra.mxu1 %v1903_v41 }
 0x2f1   : > { %v1882_v45 = vmul.f32 %v3104_v42, %v3510_v11  ;;  %2972 = vmatprep.subr.mxu0 %v3208_v35  ;;  %2967 = vmatprep.subr.mxu1 %v3208_v35 }
 0x2f2   : > { %2968 = vmatpush3.msra.mxu1 %v1902_v44  ;;  %2969 = vmatprep.mubr.msk.f32.mxu1 %vm3209_vm2, %v3208_v35 }
 0x2f3   : > { %1890 = vst.msk [vmem:[%s3555_s13 + $0x2] sm:$0x1] %vm1799_vm6, %v1882_v45  ;;  %2963 = vmatmul.mubr.msk.f32.vlgmr.msra.gmra.mxu0 %vm1211_vm3, %v1882_v45  ;;  %2979 = vmatprep.subr.mxu1 %v3208_v35 }
 0x2f4   : > { %v3106_v48 = vpop.eup %3105  ;;  %2973 = vmatpush3.msra.mxu0 %v1905_v46  ;;  %2976 = vmatprep.mubr.msk.f32.mxu0 %vm3209_vm2, %v3208_v35 }
 0x2f5   : > { %2974 = vmatprep.subr.mxu0 %v3208_v35  ;;  %v1883_v49 = vmul.f32 %v3106_v48, %v3514_v13 }
 0x2f6   : > { %v3108_v51 = vpop.eup %3107  ;;  %2975 = vmatpush3.msra.mxu0 %v1904_v47 }
 0x2f7   : > { %1891 = vst.msk [vmem:[%s3555_s13 + $0x3] sm:$0x1] %vm1799_vm6, %v1883_v49  ;;  %2970 = vmatmul.mubr.msk.f32.vlgmr.msra.gmra.mxu1 %vm1211_vm3, %v1883_v49  ;;  %v1884_v52 = vmul.f32 %v3108_v51, %v3518_v15  ;;  %2986 = vmatprep.subr.mxu0 %v3208_v35 }
 0x2f8   : > { %v3110_v55 = vpop.eup %3109  ;;  %2980 = vmatpush3.msra.mxu1 %v1907_v50  ;;  %2983 = vmatprep.mubr.msk.f32.mxu1 %vm3209_vm2, %v3208_v35 }
 0x2f9   : > { %1892 = vst.msk [vmem:[%s3555_s13 + $0x4] sm:$0x1] %vm1799_vm6, %v1884_v52  ;;  %2977 = vmatmul.mubr.msk.f32.vlgmr.msra.gmra.mxu0 %vm1211_vm3, %v1884_v52  ;;  %2981 = vmatprep.subr.mxu1 %v3208_v35  ;;  %v1885_v57 = vmul.f32 %v3110_v55, %v3522_v17 }
 0x2fa   : > { %2987 = vmatpush3.msra.mxu0 %v1909_v53  ;;  %2982 = vmatpush3.msra.mxu1 %v1906_v54 }
 0x2fb   : > { %2988 = vmatprep.subr.mxu0 %v3208_v35  ;;  %2990 = vmatprep.mubr.msk.f32.mxu0 %vm3209_vm2, %v3208_v35  ;;  %1893 = vst.msk [vmem:[%s3555_s13 + $0x5] sm:$0x1] %vm1799_vm6, %v1885_v57 }
 0x2fc   : > { %v3112_v59 = vpop.eup %3111  ;;  %2989 = vmatpush3.msra.mxu0 %v1908_v56  ;;  %2984 = vmatmul.mubr.msk.f32.vlgmr.msra.gmra.mxu1 %vm1211_vm3, %v1885_v57 }
 0x2fd   : > { %v1886_v60 = vmul.f32 %v3112_v59, %v3526_v19  ;;  %2993 = vmatprep.subr.mxu1 %v3208_v35  ;;  %2997 = vmatprep.mubr.msk.f32.mxu1 %vm3209_vm2, %v3208_v35  ;;  %v3114_v62 = vpop.eup %3113 }
 0x2fe   : > { %2994 = vmatpush3.msra.mxu1 %v1911_v58  ;;  %v1887_v63 = vmul.f32 %v3114_v62, %v3530_v21 }
 0x2ff   : > { %1894 = vst.msk [vmem:[%s3555_s13 + $0x6] sm:$0x1] %vm1799_vm6, %v1886_v60  ;;  %2991 = vmatmul.mubr.msk.f32.vlgmr.msra.gmra.mxu0 %vm1211_vm3, %v1886_v60  ;;  %2995 = vmatprep.subr.mxu1 %v3208_v35 }
 0x300   : > { %2996 = vmatpush3.msra.mxu1 %v1910_v61  ;;  %1895 = vst.msk [vmem:[%s3555_s13 + $0x7] sm:$0x1] %vm1799_vm6, %v1887_v63 }
 0x301   : > { %2998 = vmatmul.mubr.msk.f32.vlgmr.msra.gmra.mxu1 %vm1211_vm3, %v1887_v63 }
 0x302   : > { %3128 = shalt.err (!%p3125_p3)
}
 0x303   : > { %s3129_s13 = scalar_lea.hbm %s3626_s22, 128  ;;  %s3133_s17 = scalar_lea.hbm %s3725_s8, 256 }
 0x304   : > { %p3130_p4 = scmp.ne.s32.totalorder %s3626_s22, %s3129_s13  ;;  %p3134_p9 = scmp.lt.s32.totalorder %s3626_s22, %s3725_s8 }
 0x305   : > { %p3135_p10 = scmp.lt.s32.totalorder %s3133_s17, %s3129_s13 }
 0x306   : > { %p3131_p7 = pnand %p3130_p4, %p3297_p5 }
 0x307   : > { %p3136_p11 = por %p3135_p10, %p3134_p9 }
 0x308   : > { %p3132_p8 = pneg %p3131_p7 }
 0x30a   : > { %p3137_p12 = pnand %p3136_p11, %p3132_p8 }
 0x30c   : > { %3140 = shalt.err (!%p3137_p12)
}
 0x30d   : > { %s3211_s25 = smov 16   ;;  %s3212_s26 = smov 1   ;;  %vm2496_vm13 = vcmask 253952  }
 0x30e   : > { %3001 = dma.vmem_to_hbm [thread:$0]  (%p3297_p5), %s3629_s23, 128, %s3626_s22, %s2511_s24, %s3211_s25, %s3211_s25, %s3212_s26  }
 0x30f   : > { %s3730_s12 = sshll.u32 %s3549_s20, 3  ;;  %s3731_s23 = sshll.u32 %s3280_s9, 7 }
 0x310   : > { %s373_s18 = scalar_lea.vmem [#allocation2], %s3730_s12  ;;  %s3671_s13 = scalar_lea.hbm %s3724_s7, %s3731_s23 }
 0x311   : > { %s2524_s22 = sshll.u32 %s373_s18, 4  ;;  %s2506_s19 = scalar_lea.sflag [#allocation3], %s3549_s20  ;;  %s3673_s22 = int_to_ptr.vmem [resolvable:$true] %s2524_s22 }
 0x312   : > { %s3141_s21 = scalar_lea.vmem %s3673_s22, 128  ;;  %s3213_s9 = smov [#allocation2]  }
 0x313   : > { %p3142_p13 = scmp.ne.s32.totalorder %s3673_s22, %s3141_s21  ;;  %s3145_s17 = sshll.u32 %s3213_s9, 4  ;;  %s3146_s17 = int_to_ptr.vmem [resolvable:$false] %s3145_s17 }
 0x314   : > { %s3147_s12 = scalar_lea.vmem %s3146_s17, 256  ;;  %p3148_p2 = scmp.lt.s32.totalorder %s3673_s22, %s3146_s17 }
 0x315   : > { %p3143_p0 = pnand %p3142_p13, %p3297_p5  ;;  %p3149_p3 = scmp.lt.s32.totalorder %s3147_s12, %s3141_s21 }
 0x317   : > { %p3144_p1 = pneg %p3143_p0  ;;  %p3150_p4 = por %p3149_p3, %p3148_p2 }
 0x319   : > { %p3151_p7 = pnand %p3150_p4, %p3144_p1 }
 0x3ad   : > { %v1981_v35 = vpop.f32.mrf.mxu0 }
 0x3ae   : > { %2497 = vst.msk [vmem:[%s373_s18] sm:$0x1] %vm2496_vm13, %v1981_v35  ;;  %v2054_v0 = vpop.f32.mrf.mxu1 }
 0x3af   : > { %2498 = vst.msk [vmem:[%s373_s18 + $0x1] sm:$0x1] %vm2496_vm13, %v2054_v0  ;;  %v2950_v1 = vpop.f32.mrf.mxu0 }
 0x3b0   : > { %v2957_v2 = vpop.f32.mrf.mxu1 }
 0x3b3   : > { %v2127_v3 = vpop.f32.mrf.mxu0 }
 0x3b4   : > { %2499 = vst.msk [vmem:[%s373_s18 + $0x2] sm:$0x1] %vm2496_vm13, %v2127_v3 }
 0x3b5   : > { %v2964_v4 = vpop.f32.mrf.mxu0 }
 0x3b7   : > { %v2200_v5 = vpop.f32.mrf.mxu1 }
 0x3b8   : > { %2500 = vst.msk [vmem:[%s373_s18 + $0x3] sm:$0x1] %vm2496_vm13, %v2200_v5 }
 0x3b9   : > { %v2273_v6 = vpop.f32.mrf.mxu0  ;;  %v2971_v7 = vpop.f32.mrf.mxu1 }
 0x3ba   : > { %2501 = vst.msk [vmem:[%s373_s18 + $0x4] sm:$0x1] %vm2496_vm13, %v2273_v6 }
 0x3bb   : > { %v2978_v8 = vpop.f32.mrf.mxu0 }
 0x3bc   : > { %v2346_v9 = vpop.f32.mrf.mxu1 }
 0x3bd   : > { %2502 = vst.msk [vmem:[%s373_s18 + $0x5] sm:$0x1] %vm2496_vm13, %v2346_v9 }
 0x3be   : > { %v2985_v10 = vpop.f32.mrf.mxu1 }
 0x3bf   : > { %v2419_v11 = vpop.f32.mrf.mxu0 }
 0x3c0   : > { %2503 = vst.msk [vmem:[%s373_s18 + $0x6] sm:$0x1] %vm2496_vm13, %v2419_v11 }
 0x3c1   : > { %v2992_v12 = vpop.f32.mrf.mxu0  ;;  %v2492_v13 = vpop.f32.mrf.mxu1 }
 0x3c2   : > { %2504 = vst.msk [vmem:[%s373_s18 + $0x7] sm:$0x1] %vm2496_vm13, %v2492_v13 }
 0x3c3   : > { %v2999_v14 = vpop.f32.mrf.mxu1 }
 0x3c4   : > { %3154 = shalt.err (!%p3151_p7)
}
 0x3c5   : > { %s3155_s18 = scalar_lea.hbm %s3671_s13, 128  ;;  %s3159_s24 = scalar_lea.hbm %s3724_s7, 256 }
 0x3c6   : > { %p3156_p8 = scmp.ne.s32.totalorder %s3671_s13, %s3155_s18  ;;  %p3160_p11 = scmp.lt.s32.totalorder %s3671_s13, %s3724_s7 }
 0x3c7   : > { %p3161_p12 = scmp.lt.s32.totalorder %s3159_s24, %s3155_s18 }
 0x3c8   : > { %p3157_p9 = pnand %p3156_p8, %p3297_p5 }
 0x3c9   : > { %p3162_p13 = por %p3161_p12, %p3160_p11 }
 0x3ca   : > { %p3158_p10 = pneg %p3157_p9 }
 0x3cc   : > { %p3163_p0 = pnand %p3162_p13, %p3158_p10 }
 0x3ce   : > { %3166 = shalt.err (!%p3163_p0)
}
 0x3cf   : > { %3000 = dma.vmem_to_hbm [thread:$0]  (%p3297_p5), %s3673_s22, 128, %s3671_s13, %s2506_s19, %s3211_s25, %s3211_s25, %s3212_s26  }
 0x3d0 PF: > { %p3011_p1 = scmp.ge.s32.totalorder %s3205_s30, 2  ;;  %s2555_s21 = sand.u32 1, %s3193_s27  }
 0x3d1   : > { %s2556_s17 = scalar_lea.sflag [#allocation3], %s2555_s21 }
 0x3d2   : > { %p3005_p2 = pnand %p3011_p1, %p3301_p6 }
 0x3d4   : > { %p3006_p3 = pneg %p3005_p2 }
 0x3d6   : > { %3184 = dma.done.wait (%p3006_p3), %s2556_s17, 128  }
 0x3d7   : > { %3186 = vsyncadd (%p3006_p3), %s2556_s17, 4294967168  ;;  %s2565_s12 = scalar_lea.sflag [#allocation5], %s2555_s21 }
 0x3d8   : > { %3188 = dma.done.wait (%p3006_p3), %s2565_s12, 128  }
 0x3d9   : > { %3190 = vsyncadd (%p3006_p3), %s2565_s12, 4294967168  ;;  %p22_p5 = scmp.ge.s32.totalorder %s3284_s11, 4   ;;  %s3732_s27 = smov %s3197_s28 }
 0x3da   : > { %s3733_s28 = smov %s3201_s29  ;;  %s3734_s29 = smov %s3295_s14 }
 0x3db   : > { %s3735_s30 = smov %s3284_s11  ;;  %24 = sbr.rel (!%p22_p5) target bundleno = 5 (0x5), region = 112 }
 0x3e0   :  { %2570 = vsyncpa [#allocation3], 1 }
 0x3e1   :  { %2572 = vsyncpa [#allocation3 + $0x1], 1 }
 0x3e2   :  { %2573 = vsyncpa [#allocation5], 1 }
 0x3e3   :  { %2575 = vsyncpa [#allocation5 + $0x1], 1 }

</bundles_post_ra>
